<compile_context>
chip_gen: v5e
topology: v5e:2x2
jax: 0.10.0
libtpu: 0.0.40
codegen_flags: <defaults>
</compile_context>

<pallas_src>
import jax
import jax.numpy as jnp
from jax.experimental import pallas as pl
from jax.experimental.pallas import tpu as pltpu


def _hardswish_kernel(x_ref, o_ref):
    # Python-float constants are weakly typed, so bf16/f16 inputs compute
    # natively (no f32 up/down casts) and f32 inputs compute in f32.
    # The extra multiply is free: this kernel is HBM-bound, not VALU-bound.
    x = x_ref[...]
    y = x * (jnp.clip(x + 3.0, 0.0, 6.0) * (1.0 / 6.0))
    o_ref[...] = y.astype(o_ref.dtype)


def hardswish(
    x: jax.Array,
    *,
    lane_width: int = 128,
    target_block_bytes: int = 8 * 1024 * 1024,  # ~8 MiB/block; 4x double-buffered = 32 MiB
) -> jax.Array:
    """Elementwise HardSwish over an arbitrary-shaped array (NCHW expected)."""
    orig_shape = x.shape
    orig_dtype = x.dtype
    n = x.size
    itemsize = jnp.dtype(orig_dtype).itemsize

    # ---- lane-dense slab: pad only to a multiple of 128 (often not at all) ----
    rows = pl.cdiv(n, lane_width)
    pad = rows * lane_width - n

    flat = x.reshape(-1)
    if pad:
        flat = jnp.pad(flat, (0, pad))   # < 128 elements of padding, worst case
    slab = flat.reshape(rows, lane_width)

    # ---- dtype-aware sublane alignment: f32->8, bf16/f16->16, int8/fp8->32 ----
    sublane = {4: 8, 2: 16, 1: 32}.get(itemsize, 8)

    # Rows per block: ~target_block_bytes, always a multiple of the dtype tile.
    t_max = max(sublane,
                (target_block_bytes // (lane_width * itemsize)) // sublane * sublane)

    if rows <= t_max:
        # Single block equal to the full array dims (allowed even if unaligned),
        # so small tensors need no row padding at all.
        t = rows
        grid = (1,)
    else:
        # Ragged grid: Pallas masks the final partial block -- no row padding.
        t = t_max
        grid = (pl.cdiv(rows, t),)

    out = pl.pallas_call(
        _hardswish_kernel,
        out_shape=jax.ShapeDtypeStruct((rows, lane_width), orig_dtype),
        grid_spec=pl.GridSpec(
            grid=grid,
            in_specs=[pl.BlockSpec((t, lane_width), lambda i: (i, 0))],
            out_specs=pl.BlockSpec((t, lane_width), lambda i: (i, 0)),
        ),
        compiler_params=pltpu.CompilerParams(
            # One grid axis, fully independent steps: lets the runtime shard
            # across v7x's 2 TensorCores; measured no-op on single-TC v5e/v6e.
            dimension_semantics=("parallel",),
            # 2 in + 2 out buffers at ~8 MiB = ~32 MiB; 48 MiB leaves headroom
            # and stays under v7x's 64 MiB/TC physical VMEM (v5e/v6e have 128 MiB).
            vmem_limit_bytes=48 * 1024 * 1024,
        ),
        # Advisory hint so XLA can overlap surrounding ops with this HBM-bound call.
        cost_estimate=pl.CostEstimate(
            flops=4 * n, transcendentals=0, bytes_accessed=2 * n * itemsize),
    )(slab)

    out = out.reshape(-1)
    if pad:
        out = out[:n]   # trailing slice emitted only when a pad was emitted
    return out.reshape(orig_shape)


if __name__ == "__main__":
    key = jax.random.PRNGKey(0)
    # NCHW input, small shape consistent with a MobileNetV3 feature map.
    x = jax.random.normal(key, (2, 4, 16, 16), dtype=jnp.float32) * 4.0

    y = hardswish(x)
    y = jax.block_until_ready(y)

    # Reference check in plain JAX (same semantics as x * F.relu6(x + 3) / 6).
    y_ref = x * (jnp.clip(x + 3.0, 0.0, 6.0) / 6.0)
    assert y.shape == x.shape and y.dtype == x.dtype
    assert jnp.max(jnp.abs(y - y_ref)) < 1e-5

    print("KERNEL_OK")
</pallas_src>

<mosaic_0001>
module attributes {stable_mosaic.version = 11 : i64} {
  func.func @_hardswish_kernel(%arg0: i32, %arg1: memref<16x128xf32, #tpu.memory_space<vmem>>, %arg2: memref<16x128xf32, #tpu.memory_space<vmem>>) attributes {dimension_semantics = [#tpu.dimension_semantics<parallel>], iteration_bounds = array<i64: 1>, scalar_prefetch = 0 : i64, scratch_operands = 0 : i64, tpu.core_type = #tpu.core_type<tc>, window_params = [{transform_indices = @transform_0, window_bounds = array<i64: 16, 128>}, {transform_indices = @transform_1, window_bounds = array<i64: 16, 128>}]} {
    %c0 = arith.constant 0 : index
    %c0_0 = arith.constant 0 : index
    %0 = vector.load %arg1[%c0, %c0_0] : memref<16x128xf32, #tpu.memory_space<vmem>>, vector<16x128xf32>
    %cst = arith.constant 3.000000e+00 : f32
    %1 = vector.broadcast %cst : f32 to vector<16x128xf32>
    %2 = arith.addf %0, %1 : vector<16x128xf32>
    %cst_1 = arith.constant 0.000000e+00 : f32
    %cst_2 = arith.constant 6.000000e+00 : f32
    %3 = vector.broadcast %cst_1 : f32 to vector<16x128xf32>
    %4 = arith.maximumf %3, %2 : vector<16x128xf32>
    %5 = vector.broadcast %cst_2 : f32 to vector<16x128xf32>
    %6 = arith.minimumf %5, %4 : vector<16x128xf32>
    %cst_3 = arith.constant 0.166666672 : f32
    %7 = vector.broadcast %cst_3 : f32 to vector<16x128xf32>
    %8 = arith.mulf %6, %7 : vector<16x128xf32>
    %9 = arith.mulf %0, %8 : vector<16x128xf32>
    %c0_4 = arith.constant 0 : index
    %c0_5 = arith.constant 0 : index
    %10 = vector.load %arg2[%c0_4, %c0_5] : memref<16x128xf32, #tpu.memory_space<vmem>>, vector<16x128xf32>
    tpu.vector_store %arg2[%c0_4, %c0_5], %9 {strides = array<i32>} : memref<16x128xf32, #tpu.memory_space<vmem>>, vector<16x128xf32>,
    return
  }
  func.func @transform_0(%arg0: i32) -> (i32, i32) {
    %c0_i32 = arith.constant 0 : i32
    %c0_i32_0 = arith.constant 0 : i32
    return %arg0, %c0_i32 : i32, i32
  }
  func.func @transform_1(%arg0: i32) -> (i32, i32) {
    %c0_i32 = arith.constant 0 : i32
    %c0_i32_0 = arith.constant 0 : i32
    return %arg0, %c0_i32 : i32, i32
  }
}

</mosaic_0001>

<bundles_post_ra>
// kernel: tpu_custom_call.1
= control target key start
LH: loop header
LB: loop body
LE: loop exit
PB: predicated region body
PF: predicated region fallthrough
CT: control target
= control target key end

     0   :  { %6 = vsyncpa [#allocation3], 0  ;;  %s134_s0 = inlined_call_operand.hbm [shape: f32[16,128], index: 0, kind: input, shape index: {}]   ;;  %s135_s1 = inlined_call_operand.hbm [shape: f32[16,128], index: 1, kind: output, shape index: {}]  }
   0x1   :  { %7 = vsyncpa [#allocation4], 0  ;;  %s12_s8 = sshll.u32 %s134_s0, 4  ;;  %s114_s9 = smov [#allocation2]   ;;  %s13_s8 = int_to_ptr.hbm [resolvable:$true] %s12_s8 }
   0x2   :  { %s14_s10 = sshll.u32 %s114_s9, 4  ;;  %s115_s11 = smov 128   ;;  %s15_s10 = int_to_ptr.vmem [resolvable:$true] %s14_s10 }
   0x3   :  { %s116_s12 = smov 8  }
   0x4   :  { %20 = dma.hbm_to_vmem [thread:$0]  %s13_s8, 256, %s15_s10, [#allocation3], %s115_s11, %s115_s11, %s116_s12  }
   0x5   :  { %110 = dma.done.wait [#allocation3], 256  }
   0x6   :  { %111 = vsyncadd [#allocation3], 4294967040  ;;  %v25_v0 = vld [vmem:[#allocation2] sm:$0xff]  ;;  %v26_v1 = vld [vmem:[#allocation2 + $0x8] sm:$0xff]  ;;  %s117_s0 = smov [#allocation5]   ;;  %s45_s16 = sshll.u32 %s135_s1, 4  ;;  %s46_s16 = int_to_ptr.hbm [resolvable:$true] %s45_s16 }
   0x7   :  { %v27_v2 = vadd.f32 3.0, %v25_v0  ;;  %v28_v3 = vadd.f32 3.0, %v26_v1  ;;  %s43_s13 = sshll.u32 %s117_s0, 4  ;;  %s44_s13 = int_to_ptr.vmem [resolvable:$true] %s43_s13 }
   0x9   :  { %v29_v4 = vmax.f32 %v27_v2, 0.0  ;;  %v30_v5 = vmax.f32 %v28_v3, 0.0 }
   0xb   :  { %v31_v6 = vmin.f32 %v29_v4, 6.0  ;;  %v32_v7 = vmin.f32 %v30_v5, 6.0 }
   0xd   :  { %v33_v8 = vmul.f32 0.16666667, %v31_v6  ;;  %v34_v9 = vmul.f32 0.16666667, %v32_v7 }
   0xf   :  { %v35_v10 = vmul.f32 %v33_v8, %v25_v0  ;;  %v36_v11 = vmul.f32 %v34_v9, %v26_v1 }
  0x11   :  { %37 = vst [vmem:[#allocation5] sm:$0xff] %v35_v10 }
  0x12   :  { %38 = vst [vmem:[#allocation5 + $0x8] sm:$0xff] %v36_v11 }
  0x13   :  { %51 = dma.vmem_to_hbm [thread:$0]  %s44_s13, 256, %s46_s16, [#allocation4], %s115_s11, %s115_s11, %s116_s12  }
  0x14   :  { %112 = dma.done.wait [#allocation4], 256  }
  0x15   :  { %113 = vsyncadd [#allocation4], 4294967040 }
  0x16   :  { %56 = vsyncpa [#allocation3], 1 }
  0x17   :  { %57 = vsyncpa [#allocation4], 1 }

</bundles_post_ra>
